<compile_context>
chip_gen: v6e
topology: v6e:2x2x1
jax: 0.10.0
libtpu: 0.0.40
codegen_flags: <defaults>
</compile_context>

<pallas_src>
import functools

import jax
import jax.numpy as jnp
from jax.experimental import pallas as pl
from jax.experimental.pallas import tpu as pltpu


def _round_up(x, m):
    return (x + m - 1) // m * m


def _choose_tm(M, K_lanes, E_pad, c_bytes, o_bytes, sub):
    """Pick the row-tile TM and the (possibly padded) row count M_pad."""
    budget = 30 * 1024 * 1024  # conservative: fits the scoped-VMEM default on all gens

    def est(tm):
        return (2 * tm * K_lanes * c_bytes      # patch tile, double-buffered (lane-padded)
                + 2 * tm * E_pad * o_bytes      # output tile, double-buffered
                + 2 * K_lanes * E_pad * c_bytes  # resident weight (Pallas still 2-buffers)
                + 2 * 8 * E_pad * 4)            # params (bias/gamma/beta)

    # Largest 256-multiple tile that divides M exactly (no M pad, no row-slice
    # copy) while leaving >= 2 grid steps (keeps both v7x TensorCores busy).
    for tm in (1024, 768, 512, 256):
        if M % tm == 0 and M // tm >= 2 and est(tm) <= budget:
            return tm, M
    # Otherwise pad M up to a multiple of the largest fitting 256-multiple tile.
    for tm in (1024, 768, 512, 256):
        if M >= 2 * tm and est(tm) <= budget:
            return tm, _round_up(M, tm)
    # Small-M fallback: split into two sublane-aligned tiles so the grid still
    # has >= 2 steps whenever possible.
    tm = max(_round_up(-(-M // 2), sub), sub)
    return tm, _round_up(M, tm)


def _patch_embed_kernel(patches_ref, w_ref, params_ref, out_ref, *, inv_e, eps):
    # patches_ref: (TM, K)      row tile of the (M, K) patch matrix (native dtype)
    # w_ref:       (K, E_pad)   projection weight, zero-padded columns
    # params_ref:  (3, E_pad)   f32 rows = [bias, gamma, beta], zero-padded
    # out_ref:     (TM, E_pad)
    y = jnp.dot(patches_ref[...], w_ref[...],
                preferred_element_type=jnp.float32)          # MXU, f32 accumulation
    bias = params_ref[0:1, :]
    gamma = params_ref[1:2, :]
    beta = params_ref[2:3, :]
    y = y + bias                                             # padded cols stay 0

    # LayerNorm over embed_dim: single cross-lane pass of sum / sum-of-squares
    # in f32.  Padded columns contribute exactly 0 to both sums, so dividing by
    # the true E gives the exact statistics of the unpadded row.
    s1 = jnp.sum(y, axis=-1, keepdims=True)
    s2 = jnp.sum(y * y, axis=-1, keepdims=True)
    mean = s1 * inv_e
    var = jnp.maximum(s2 * inv_e - mean * mean, 0.0)
    rstd = jax.lax.rsqrt(var + eps)
    out = (y - mean) * rstd * gamma + beta                   # padded cols -> 0
    out_ref[...] = out.astype(out_ref.dtype)


@functools.partial(
    jax.jit, static_argnames=("patch_size", "compute_dtype", "out_dtype", "eps"))
def patch_embed_forward(x, proj_w, proj_b, ln_gamma, ln_beta, *,
                        patch_size, compute_dtype=None, out_dtype=None, eps=1e-5):
    """x: (B, C, H, W) NCHW.  Returns (out, h, w) with out: (B, N, embed_dim)."""
    B, C, H, W = x.shape
    p = patch_size
    assert H % p == 0 and W % p == 0, "input size must be divisible by patch_size"
    h, w = H // p, W // p
    N = h * w
    E = proj_w.shape[0]
    K = C * p * p
    M = B * N

    cdt = jnp.dtype(compute_dtype) if compute_dtype is not None else jnp.dtype(x.dtype)
    odt = jnp.dtype(out_dtype) if out_dtype is not None else jnp.dtype(x.dtype)

    # Lane-dense output width; K stays unpadded (tiny, full-dim block is legal).
    E_pad = _round_up(E, 128)
    K_lanes = _round_up(K, 128)                  # VMEM lane footprint of a K-wide tile
    sub = max(8, 32 // cdt.itemsize)             # sublane packing: 8 f32 / 16 bf16 / 32 i8

    TM, M_pad = _choose_tm(M, K_lanes, E_pad, cdt.itemsize, odt.itemsize, sub)

    # --- wrapper glue: im2col for the stride-p "conv" ----------------------
    # (B, C, h, p, w, p) -> (B, h, w, C, p, p) -> (M, K) in (c, ph, pw) order,
    # matching Conv2d weight (E, C, p, p) -> (K, E).  allow_input_fusion below
    # lets XLA fuse this producer into the pallas_call input DMA when it can.
    patches = (x.reshape(B, C, h, p, w, p)
                .transpose(0, 2, 4, 1, 3, 5)
                .reshape(M, K)
                .astype(cdt))
    if M_pad != M:
        patches = jnp.pad(patches, ((0, M_pad - M), (0, 0)))

    w_mat = proj_w.reshape(E, K).T.astype(cdt)
    if E_pad != E:
        w_mat = jnp.pad(w_mat, ((0, 0), (0, E_pad - E)))

    # Pack bias / gamma / beta into one f32 (3, E_pad) operand (single DMA
    # stream; padded columns are zero so they never contribute).
    params = jnp.stack([proj_b, ln_gamma, ln_beta]).astype(jnp.float32)
    if E_pad != E:
        params = jnp.pad(params, ((0, 0), (0, E_pad - E)))

    # VMEM limit: double-buffered patch/output tiles + (small) resident weight.
    vmem_est = (2 * TM * K_lanes * cdt.itemsize
                + 2 * TM * E_pad * odt.itemsize
                + 2 * K_lanes * E_pad * cdt.itemsize
                + 2 * 8 * E_pad * 4)
    vmem_limit = int(min(max(2 * vmem_est, 8 * 1024 * 1024), 40 * 1024 * 1024))

    kernel = functools.partial(_patch_embed_kernel, inv_e=float(1.0 / E), eps=float(eps))

    out = pl.pallas_call(
        kernel,
        out_shape=jax.ShapeDtypeStruct((M_pad, E_pad), odt),
        grid_spec=pltpu.PrefetchScalarGridSpec(
            num_scalar_prefetch=0,
            grid=(M_pad // TM,),
            in_specs=[
                pl.BlockSpec((TM, K), lambda i: (i, 0)),
                pl.BlockSpec((K, E_pad), lambda i: (0, 0)),
                pl.BlockSpec((3, E_pad), lambda i: (0, 0)),
            ],
            out_specs=pl.BlockSpec((TM, E_pad), lambda i: (i, 0)),
        ),
        compiler_params=pltpu.CompilerParams(
            dimension_semantics=("parallel",),
            vmem_limit_bytes=vmem_limit,
            allow_input_fusion=[True, False, False],
        ),
    )(patches, w_mat, params)

    if M_pad != M or E_pad != E:
        out = out[:M, :E]
    return out.reshape(B, N, E), h, w


def _reference(x, proj_w, proj_b, ln_gamma, ln_beta, patch_size):
    """Pure-JAX reference using lax.conv (NCHW), mirrors the PyTorch forward."""
    y = jax.lax.conv_general_dilated(
        x.astype(jnp.float32), proj_w.astype(jnp.float32),
        window_strides=(patch_size, patch_size), padding="VALID",
        dimension_numbers=("NCHW", "OIHW", "NCHW"),
    ) + proj_b.astype(jnp.float32)[None, :, None, None]
    B, E, h, w = y.shape
    y = y.reshape(B, E, h * w).transpose(0, 2, 1)  # (B, N, E)
    mean = jnp.mean(y, axis=-1, keepdims=True)
    var = jnp.mean((y - mean) ** 2, axis=-1, keepdims=True)
    y = (y - mean) * jax.lax.rsqrt(var + 1e-5)
    return y * ln_gamma + ln_beta


if __name__ == "__main__":
    # Small shapes consistent with the module: img_size=16, patch_size=2,
    # in_chans=4, embed_dim=32, batch=2.
    B, C, HW, P, E = 2, 4, 16, 2, 32

    key = jax.random.PRNGKey(0)
    kx, kw, kb = jax.random.split(key, 3)

    x = jax.random.normal(kx, (B, C, HW, HW), dtype=jnp.float32)
    # trunc_normal_(std=0.02) on proj weight (synthetic deterministic init)
    proj_w = 0.02 * jax.random.truncated_normal(kw, -2.0, 2.0, (E, C, P, P), jnp.float32)
    proj_b = 0.01 * jax.random.normal(kb, (E,), dtype=jnp.float32)
    ln_gamma = jnp.ones((E,), dtype=jnp.float32)   # nn.LayerNorm default init
    ln_beta = jnp.zeros((E,), dtype=jnp.float32)

    ref = _reference(x, proj_w, proj_b, ln_gamma, ln_beta, P)

    # f32 compute path (matches the PyTorch module numerics).
    out, h, w = patch_embed_forward(x, proj_w, proj_b, ln_gamma, ln_beta, patch_size=P)
    out = jax.block_until_ready(out)
    assert out.shape == (B, (HW // P) * (HW // P), E)
    assert (h, w) == (HW // P, HW // P)
    assert jnp.allclose(out, ref, atol=5e-4, rtol=5e-4)

    # bf16 MXU fast path (f32 accumulation + f32 LayerNorm epilogue).
    out_bf16, h2, w2 = patch_embed_forward(
        x, proj_w, proj_b, ln_gamma, ln_beta, patch_size=P,
        compute_dtype=jnp.bfloat16)
    out_bf16 = jax.block_until_ready(out_bf16)
    assert out_bf16.shape == out.shape and (h2, w2) == (h, w)
    assert jnp.allclose(out_bf16, ref, atol=3e-2, rtol=3e-2)

    print("KERNEL_OK")
</pallas_src>

<mosaic_0001>
module attributes {stable_mosaic.version = 11 : i64} {
  func.func @_patch_embed_kernel(%arg0: i32, %arg1: memref<64x16xf32, #tpu.memory_space<vmem>>, %arg2: memref<16x128xf32, #tpu.memory_space<vmem>>, %arg3: memref<3x128xf32, #tpu.memory_space<vmem>>, %arg4: memref<64x128xf32, #tpu.memory_space<vmem>>) attributes {dimension_semantics = [#tpu.dimension_semantics<parallel>], iteration_bounds = array<i64: 2>, scalar_prefetch = 0 : i64, scratch_operands = 0 : i64, tpu.core_type = #tpu.core_type<tc>, window_params = [{transform_indices = @transform_0, window_bounds = array<i64: 64, 16>}, {pipeline_mode = #tpu.pipeline_mode<synchronous>, transform_indices = @transform_1, window_bounds = array<i64: 16, 128>}, {pipeline_mode = #tpu.pipeline_mode<synchronous>, transform_indices = @transform_2, window_bounds = array<i64: 3, 128>}, {transform_indices = @transform_3, window_bounds = array<i64: 64, 128>}]} {
    %c0 = arith.constant 0 : index
    %c0_0 = arith.constant 0 : index
    %0 = vector.load %arg1[%c0, %c0_0] : memref<64x16xf32, #tpu.memory_space<vmem>>, vector<64x16xf32>
    %c0_1 = arith.constant 0 : index
    %c0_2 = arith.constant 0 : index
    %1 = vector.load %arg2[%c0_1, %c0_2] : memref<16x128xf32, #tpu.memory_space<vmem>>, vector<16x128xf32>
    %cst = arith.constant dense<0.000000e+00> : vector<64x128xf32>
    %2 = tpu.matmul %0, %1, %cst {dimension_numbers = #tpu.dot_dimension_numbers<[1], [0], [0], [1], [0, 0, 1, 1], [], []>} : vector<64x16xf32>, vector<16x128xf32>, vector<64x128xf32> -> vector<64x128xf32>
    %c0_3 = arith.constant 0 : index
    %c0_4 = arith.constant 0 : index
    %3 = vector.load %arg3[%c0_3, %c0_4] : memref<3x128xf32, #tpu.memory_space<vmem>>, vector<1x128xf32>
    %c1 = arith.constant 1 : index
    %c0_5 = arith.constant 0 : index
    %4 = vector.load %arg3[%c1, %c0_5] : memref<3x128xf32, #tpu.memory_space<vmem>>, vector<1x128xf32>
    %c2 = arith.constant 2 : index
    %c0_6 = arith.constant 0 : index
    %5 = vector.load %arg3[%c2, %c0_6] : memref<3x128xf32, #tpu.memory_space<vmem>>, vector<1x128xf32>
    %6 = vector.broadcast %3 : vector<1x128xf32> to vector<64x128xf32>
    %7 = arith.addf %2, %6 : vector<64x128xf32>
    %cst_7 = arith.constant dense<0.000000e+00> : vector<64xf32>
    %8 = vector.multi_reduction <add>, %7, %cst_7 [1] : vector<64x128xf32> to vector<64xf32>
    %9 = vector.shape_cast %8 : vector<64xf32> to vector<64x1xf32>
    %10 = arith.mulf %7, %7 : vector<64x128xf32>
    %cst_8 = arith.constant dense<0.000000e+00> : vector<64xf32>
    %11 = vector.multi_reduction <add>, %10, %cst_8 [1] : vector<64x128xf32> to vector<64xf32>
    %12 = vector.shape_cast %11 : vector<64xf32> to vector<64x1xf32>
    %cst_9 = arith.constant 3.125000e-02 : f32
    %13 = vector.broadcast %cst_9 : f32 to vector<64x1xf32>
    %14 = arith.mulf %9, %13 : vector<64x1xf32>
    %cst_10 = arith.constant 3.125000e-02 : f32
    %15 = vector.broadcast %cst_10 : f32 to vector<64x1xf32>
    %16 = arith.mulf %12, %15 : vector<64x1xf32>
    %17 = arith.mulf %14, %14 : vector<64x1xf32>
    %18 = arith.subf %16, %17 : vector<64x1xf32>
    %cst_11 = arith.constant 0.000000e+00 : f32
    %19 = vector.broadcast %cst_11 : f32 to vector<64x1xf32>
    %20 = arith.maximumf %18, %19 : vector<64x1xf32>
    %cst_12 = arith.constant 9.99999974E-6 : f32
    %21 = vector.broadcast %cst_12 : f32 to vector<64x1xf32>
    %22 = arith.addf %20, %21 : vector<64x1xf32>
    %23 = math.rsqrt %22 : vector<64x1xf32>
    %24 = vector.broadcast %14 : vector<64x1xf32> to vector<64x128xf32>
    %25 = arith.subf %7, %24 : vector<64x128xf32>
    %26 = vector.broadcast %23 : vector<64x1xf32> to vector<64x128xf32>
    %27 = arith.mulf %25, %26 : vector<64x128xf32>
    %28 = vector.broadcast %4 : vector<1x128xf32> to vector<64x128xf32>
    %29 = arith.mulf %27, %28 : vector<64x128xf32>
    %30 = vector.broadcast %5 : vector<1x128xf32> to vector<64x128xf32>
    %31 = arith.addf %29, %30 : vector<64x128xf32>
    %c0_13 = arith.constant 0 : index
    %c0_14 = arith.constant 0 : index
    %32 = vector.load %arg4[%c0_13, %c0_14] : memref<64x128xf32, #tpu.memory_space<vmem>>, vector<64x128xf32>
    tpu.vector_store %arg4[%c0_13, %c0_14], %31 {strides = array<i32>} : memref<64x128xf32, #tpu.memory_space<vmem>>, vector<64x128xf32>,
    return
  }
  func.func @transform_0(%arg0: i32) -> (i32, i32) {
    %c0_i32 = arith.constant 0 : i32
    %c0_i32_0 = arith.constant 0 : i32
    return %arg0, %c0_i32 : i32, i32
  }
  func.func @transform_1(%arg0: i32) -> (i32, i32) {
    %c0_i32 = arith.constant 0 : i32
    %c0_i32_0 = arith.constant 0 : i32
    %c0_i32_1 = arith.constant 0 : i32
    return %c0_i32, %c0_i32_0 : i32, i32
  }
  func.func @transform_2(%arg0: i32) -> (i32, i32) {
    %c0_i32 = arith.constant 0 : i32
    %c0_i32_0 = arith.constant 0 : i32
    %c0_i32_1 = arith.constant 0 : i32
    return %c0_i32, %c0_i32_0 : i32, i32
  }
  func.func @transform_3(%arg0: i32) -> (i32, i32) {
    %c0_i32 = arith.constant 0 : i32
    %c0_i32_0 = arith.constant 0 : i32
    return %arg0, %c0_i32 : i32, i32
  }
}

</mosaic_0001>

<bundles_post_ra>
// kernel: patch_embed_forward.1
= control target key start
LH: loop header
LB: loop body
LE: loop exit
PB: predicated region body
PF: predicated region fallthrough
CT: control target
= control target key end

     0   :  { %s625_s12 = smov 0   ;;  %s785_s0 = inlined_call_operand.vmem [shape: f32[128,16], index: 0, kind: input, shape index: {}]   ;;  %s786_s1 = inlined_call_operand.vmem [shape: f32[16,128], index: 1, kind: input, shape index: {}]   ;;  %s787_s2 = inlined_call_operand.vmem [shape: f32[3,128], index: 2, kind: input, shape index: {}]   ;;  %s788_s3 = inlined_call_operand.vmem [shape: f32[128,128], index: 3, kind: output, shape index: {}]  }
   0x1 LB: > { %s521_s13 = sadd.s32 4294967295, %s603_s12   ;;  %p525_p0 = scmp.ge.s32.totalorder %s603_s12, 1  ;;  %s603_s12 = sphi %s625_s12, %s13_s12  }
   0x2   : > { %p138_p1 = scmp.lt.s32.totalorder %s603_s12, 3 }
   0x4   : > { %p139_p2 = pnand %p525_p0, %p138_p1 }
   0x5   : > { %s526_s18 = sshll.u32 (!%p139_p2), %s521_s13, 3 }
   0x6   : > { %142 = sbr.rel (%p139_p2) target bundleno = 409 (0x199), region = 32  ;;  %p163_p3 = scmp.lt.s32.totalorder (!%p139_p2), %s526_s18, 15 }
   0xb   : > { %v183_v0 = vld [vmem:[%s786_s1 + $0x8] sm:$0xff]  ;;  %v182_v1 = vld [vmem:[%s786_s1] sm:$0xff]  ;;  %s790_s18 = smov (!%p163_p3, %s526_s18), 15  ;;  %vm191_vm0 = vcmask 130048  }
   0xc   : > { %553 = vmatprep.subr.mxu0 %v183_v0  ;;  %569 = vmatprep.subr.mxu1 %v183_v0  ;;  %s527_s19 = sshll.u32 %s790_s18, 3  ;;  %v530_v10 = vld [vmem:[%s787_s2] ss:$0 sm:$0xff] }
   0xd   : > { %554 = vmatpush3.msra.mxu0 %v183_v0  ;;  %571 = vmatpush3.msra.mxu1 %v183_v0  ;;  %s166_s22 = scalar_lea.vmem %s785_s0, %s527_s19  ;;  %s741_s4 = scalar_lea.vmem %s788_s3, %s527_s19 }
   0xe   : > { %555 = vmatprep.subr.mxu0 %v182_v1  ;;  %570 = vmatprep.subr.mxu1 %v182_v1  ;;  %v174_v2 = vld [vmem:[%s166_s22] sm:$0xff]  ;;  %v175_v4 = vld [vmem:[%s166_s22 + $0x8] sm:$0xff]  ;;  %v176_v6 = vld [vmem:[%s166_s22 + $0x10] sm:$0xff] }
   0xf   : > { %556 = vmatpush3.msra.mxu0 %v182_v1  ;;  %572 = vmatpush3.msra.mxu1 %v182_v1  ;;  %v178_v3 = vld [vmem:[%s166_s22 + $0x20] sm:$0xff]  ;;  %v179_v5 = vld [vmem:[%s166_s22 + $0x28] sm:$0xff]  ;;  %v180_v7 = vld [vmem:[%s166_s22 + $0x30] sm:$0xff] }
  0x10   : > { %557 = vmatprep.mubr.msk.f32.mxu0 %vm191_vm0, %v174_v2  ;;  %563 = vmatprep.mubr.msk.f32.mxu1 %vm191_vm0, %v178_v3  ;;  %v177_v8 = vld [vmem:[%s166_s22 + $0x18] sm:$0xff] }
  0x11   : > { %558 = vmatmul.mubr.msk.f32.vlgmr.msra.gmra.mxu0 %vm191_vm0, %v175_v4  ;;  %564 = vmatmul.mubr.msk.f32.vlgmr.msra.gmra.mxu1 %vm191_vm0, %v179_v5  ;;  %v181_v9 = vld [vmem:[%s166_s22 + $0x38] sm:$0xff] }
  0x12   : > { %560 = vmatprep.mubr.msk.f32.mxu0 %vm191_vm0, %v176_v6  ;;  %566 = vmatprep.mubr.msk.f32.mxu1 %vm191_vm0, %v180_v7 }
  0x15   : > { %561 = vmatmul.mubr.msk.f32.gmra.mxu0 %vm191_vm0, %v177_v8  ;;  %567 = vmatmul.mubr.msk.f32.gmra.mxu1 %vm191_vm0, %v181_v9 }
  0xd1   : > { %v559_v11 = vpop.f32.mrf.mxu0  ;;  %v565_v12 = vpop.f32.mrf.mxu1 }
  0xd2   : > { %v658_v13 = vadd.f32 %v559_v11, %v530_v10  ;;  %v660_v14 = vadd.f32 %v565_v12, %v530_v10 }
  0xd3   : > { %v282_v15 = vpop.f32.mrf.mxu0  ;;  %v302_v18 = vpop.f32.mrf.mxu1 }
  0xd4   : > { %331 = vadd.xlane.f32.xlu1 %v660_v14  ;;  %323 = vadd.xlane.f32.xlu0 %v658_v13  ;;  %v664_v16 = vadd.f32 %v530_v10, %v282_v15  ;;  %v338_v17 = vmul.f32 %v658_v13, %v658_v13  ;;  %v669_v19 = vadd.f32 %v530_v10, %v302_v18 }
  0xd5   : > { %v342_v20 = vmul.f32 %v660_v14, %v660_v14  ;;  %v562_v21 = vpop.f32.mrf.mxu0  ;;  %v568_v24 = vpop.f32.mrf.mxu1 }
  0xd6   : > { %v673_v22 = vadd.f32 %v562_v21, %v530_v10  ;;  %v337_v23 = vmul.f32 %v664_v16, %v664_v16  ;;  %v678_v25 = vadd.f32 %v568_v24, %v530_v10  ;;  %v341_v26 = vmul.f32 %v669_v19, %v669_v19  ;;  %v722_v21 = vld [vmem:[%s787_s2 + $0x1] ss:$0 sm:$0xff] }
  0xd7   : > { %v292_v27 = vpop.f32.mrf.mxu0  ;;  %v312_v28 = vpop.f32.mrf.mxu1 }
  0xd8   : > { %347 = vadd.xlane.f32.xlu1 %v338_v17  ;;  %321 = vadd.xlane.f32.xlu0 %v664_v16  ;;  %v684_v29 = vadd.f32 %v530_v10, %v292_v27  ;;  %v686_v30 = vadd.f32 %v530_v10, %v312_v28  ;;  %v340_v31 = vmul.f32 %v673_v22, %v673_v22 }
  0xd9   : > { %v344_v33 = vmul.f32 %v678_v25, %v678_v25 }
  0xda   : > { %v339_v32 = vmul.f32 %v684_v29, %v684_v29  ;;  %v343_v34 = vmul.f32 %v686_v30, %v686_v30 }
  0xdc   : > { %355 = vadd.xlane.f32.xlu1 %v342_v20  ;;  %329 = vadd.xlane.f32.xlu0 %v669_v19 }
  0xe0   : > { %327 = vadd.xlane.f32.xlu1 %v673_v22  ;;  %345 = vadd.xlane.f32.xlu0 %v337_v23 }
  0xe4   : > { %335 = vadd.xlane.f32.xlu1 %v678_v25  ;;  %353 = vadd.xlane.f32.xlu0 %v341_v26 }
  0xe8   : > { %325 = vadd.xlane.f32.xlu1 %v684_v29  ;;  %333 = vadd.xlane.f32.xlu0 %v686_v30 }
  0xec   : > { %351 = vadd.xlane.f32.xlu1 %v340_v31  ;;  %349 = vadd.xlane.f32.xlu0 %v339_v32  ;;  %v733_v31 = vld [vmem:[%s787_s2 + $0x2] ss:$0 sm:$0xff] }
  0xf0   : > { %359 = vadd.xlane.f32.xlu1 %v344_v33  ;;  %357 = vadd.xlane.f32.xlu0 %v343_v34 }
 0x15d   : > { %v332_v35 = vpop.xlane.xlu1 %331  ;;  %v324_v36 = vpop.xlane.xlu0 %323 }
 0x15e   : > { %v362_v37 = vmul.f32 0.03125, %v324_v36  ;;  %v698_v40 = vmul.f32 0.03125, %v332_v35 }
 0x160   : > { %v378_v41 = vmul.f32 %v362_v37, %v362_v37  ;;  %v382_v47 = vmul.f32 %v698_v40, %v698_v40  ;;  %v418_v9 = vsub.f32 %v658_v13, %v362_v37  ;;  %v422_v28 = vsub.f32 %v660_v14, %v698_v40 }
 0x161   : > { %v348_v38 = vpop.xlane.xlu1 %347  ;;  %v322_v39 = vpop.xlane.xlu0 %321 }
 0x162   : > { %v370_v42 = vmul.f32 0.03125, %v348_v38  ;;  %v700_v44 = vmul.f32 0.03125, %v322_v39 }
 0x164   : > { %v386_v43 = vsub.f32 %v370_v42, %v378_v41  ;;  %v377_v52 = vmul.f32 %v700_v44, %v700_v44 }
 0x165   : > { %v356_v45 = vpop.xlane.xlu1 %355  ;;  %v330_v46 = vpop.xlane.xlu0 %329 }
 0x166   : > { %v394_v48 = vmax.f32 %v386_v43, 0.0  ;;  %v374_v49 = vmul.f32 0.03125, %v356_v45  ;;  %v706_v56 = vmul.f32 0.03125, %v330_v46 }
 0x168   : > { %v402_v50 = vadd.f32 1e-05, %v394_v48  ;;  %v390_v51 = vsub.f32 %v374_v49, %v382_v47  ;;  %v381_v62 = vmul.f32 %v706_v56, %v706_v56  ;;  %v417_v48 = vsub.f32 %v664_v16, %v700_v44 }
 0x169   : > { %v328_v53 = vpop.xlane.xlu1 %327  ;;  %v346_v54 = vpop.xlane.xlu0 %345 }
 0x16a   : > { %581 = vrsqrt.f32 %v402_v50  ;;  %v398_v55 = vmax.f32 %v390_v51, 0.0  ;;  %v369_v57 = vmul.f32 0.03125, %v346_v54  ;;  %v710_v3 = vmul.f32 0.03125, %v328_v53 }
 0x16c   : > { %v406_v58 = vadd.f32 1e-05, %v398_v55  ;;  %v385_v59 = vsub.f32 %v369_v57, %v377_v52  ;;  %v380_v10 = vmul.f32 %v710_v3, %v710_v3 }
 0x16d   : > { %v336_v60 = vpop.xlane.xlu1 %335  ;;  %v354_v61 = vpop.xlane.xlu0 %353 }
 0x16e   : > { %583 = vrsqrt.f32 %v406_v58  ;;  %v393_v63 = vmax.f32 %v385_v59, 0.0  ;;  %v373_v0 = vmul.f32 0.03125, %v354_v61  ;;  %v724_v23 = vmul.f32 0.03125, %v336_v60 }
 0x16f   : > { %v421_v58 = vsub.f32 %v669_v19, %v706_v56 }
 0x170   : > { %v401_v1 = vadd.f32 1e-05, %v393_v63  ;;  %v389_v2 = vsub.f32 %v373_v0, %v381_v62  ;;  %v384_v14 = vmul.f32 %v724_v23, %v724_v23  ;;  %v420_v63 = vsub.f32 %v673_v22, %v710_v3 }
 0x171   : > { %v326_v4 = vpop.xlane.xlu1 %325  ;;  %v334_v5 = vpop.xlane.xlu0 %333 }
 0x172   : > { %585 = vrsqrt.f32 %v401_v1  ;;  %v397_v6 = vmax.f32 %v389_v2, 0.0  ;;  %v712_v7 = vmul.f32 0.03125, %v326_v4  ;;  %v726_v13 = vmul.f32 0.03125, %v334_v5 }
 0x173   : > { %v424_v5 = vsub.f32 %v678_v25, %v724_v23 }
 0x174   : > { %v405_v8 = vadd.f32 1e-05, %v397_v6  ;;  %v379_v15 = vmul.f32 %v712_v7, %v712_v7  ;;  %v383_v39 = vmul.f32 %v726_v13, %v726_v13  ;;  %v419_v19 = vsub.f32 %v684_v29, %v712_v7 }
 0x175   : > { %v352_v11 = vpop.xlane.xlu1 %351  ;;  %v350_v12 = vpop.xlane.xlu0 %349  ;;  %v423_v3 = vsub.f32 %v686_v30, %v726_v13 }
 0x176   : > { %587 = vrsqrt.f32 %v405_v8  ;;  %v372_v17 = vmul.f32 0.03125, %v352_v11  ;;  %v371_v18 = vmul.f32 0.03125, %v350_v12 }
 0x177   : > { %v582_v20 = vpop.eup %581 }
 0x178   : > { %v426_v24 = vmul.f32 %v582_v20, %v418_v9  ;;  %v388_v26 = vsub.f32 %v372_v17, %v380_v10  ;;  %v387_v27 = vsub.f32 %v371_v18, %v379_v15 }
 0x179   : > { %v360_v32 = vpop.xlane.xlu1 %359  ;;  %v358_v33 = vpop.xlane.xlu0 %357 }
 0x17a   : > { %v438_v34 = vmul.f32 %v722_v21, %v426_v24  ;;  %v396_v35 = vmax.f32 %v388_v26, 0.0  ;;  %v395_v36 = vmax.f32 %v387_v27, 0.0  ;;  %v376_v37 = vmul.f32 0.03125, %v360_v32 }
 0x17b   : > { %v584_v38 = vpop.eup %583  ;;  %v375_v40 = vmul.f32 0.03125, %v358_v33 }
 0x17c   : > { %v450_v41 = vadd.f32 %v733_v31, %v438_v34  ;;  %v430_v42 = vmul.f32 %v584_v38, %v422_v28  ;;  %v404_v43 = vadd.f32 1e-05, %v396_v35  ;;  %v403_v45 = vadd.f32 1e-05, %v395_v36 }
 0x17d   : > { %v392_v46 = vsub.f32 %v376_v37, %v384_v14  ;;  %v391_v47 = vsub.f32 %v375_v40, %v383_v39 }
 0x17e   : > { %458 = vst [vmem:[%s741_s4 + $0x8] sm:$0xff] %v450_v41  ;;  %v442_v49 = vmul.f32 %v722_v21, %v430_v42  ;;  %589 = vrsqrt.f32 %v404_v43 }
 0x17f   : > { %v586_v50 = vpop.eup %585  ;;  %591 = vrsqrt.f32 %v403_v45  ;;  %v400_v51 = vmax.f32 %v392_v46, 0.0  ;;  %v399_v52 = vmax.f32 %v391_v47, 0.0 }
 0x180   : > { %v454_v53 = vadd.f32 %v733_v31, %v442_v49  ;;  %v425_v54 = vmul.f32 %v586_v50, %v417_v48 }
 0x181   : > { %v408_v55 = vadd.f32 1e-05, %v400_v51  ;;  %v407_v57 = vadd.f32 1e-05, %v399_v52 }
 0x182   : > { %462 = vst [vmem:[%s741_s4 + $0x28] sm:$0xff] %v454_v53  ;;  %v437_v16 = vmul.f32 %v722_v21, %v425_v54 }
 0x183   : > { %v588_v44 = vpop.eup %587  ;;  %593 = vrsqrt.f32 %v408_v55 }
 0x184   : > { %v449_v59 = vadd.f32 %v733_v31, %v437_v16  ;;  %v429_v60 = vmul.f32 %v588_v44, %v421_v58  ;;  %595 = vrsqrt.f32 %v407_v57 }
 0x186   : > { %457 = vst [vmem:[%s741_s4] sm:$0xff] %v449_v59  ;;  %v441_v61 = vmul.f32 %v722_v21, %v429_v60 }
 0x188   : > { %v453_v62 = vadd.f32 %v733_v31, %v441_v61 }
 0x18a   : > { %461 = vst [vmem:[%s741_s4 + $0x20] sm:$0xff] %v453_v62 }
 0x18b   : > { %v590_v0 = vpop.eup %589 }
 0x18c   : > { %v592_v56 = vpop.eup %591  ;;  %v428_v1 = vmul.f32 %v590_v0, %v420_v63 }
 0x18d   : > { %v427_v2 = vmul.f32 %v592_v56, %v419_v19 }
 0x18e   : > { %v440_v4 = vmul.f32 %v722_v21, %v428_v1 }
 0x18f   : > { %v439_v6 = vmul.f32 %v722_v21, %v427_v2 }
 0x190   : > { %v594_v22 = vpop.eup %593  ;;  %v452_v8 = vadd.f32 %v733_v31, %v440_v4 }
 0x191   : > { %v596_v9 = vpop.eup %595  ;;  %v451_v29 = vadd.f32 %v733_v31, %v439_v6  ;;  %v432_v7 = vmul.f32 %v594_v22, %v424_v5 }
 0x192   : > { %460 = vst [vmem:[%s741_s4 + $0x18] sm:$0xff] %v452_v8  ;;  %v431_v10 = vmul.f32 %v596_v9, %v423_v3 }
 0x193   : > { %459 = vst [vmem:[%s741_s4 + $0x10] sm:$0xff] %v451_v29  ;;  %v444_v11 = vmul.f32 %v722_v21, %v432_v7 }
 0x194   : > { %v443_v25 = vmul.f32 %v722_v21, %v431_v10 }
 0x195   : > { %v456_v12 = vadd.f32 %v733_v31, %v444_v11 }
 0x196   : > { %v455_v15 = vadd.f32 %v733_v31, %v443_v25 }
 0x197   : > { %464 = vst [vmem:[%s741_s4 + $0x38] sm:$0xff] %v456_v12 }
 0x198   : > { %463 = vst [vmem:[%s741_s4 + $0x30] sm:$0xff] %v455_v15 }
 0x199 PF: > { %s13_s12 = sadd.s32 1, %s603_s12  }
 0x19a   : > { %p10_p4 = scmp.ge.s32.totalorder %s13_s12, 4  }
 0x19c   :  { %12 = sbr.rel (!%p10_p4) target bundleno = 1 (0x1), region = 62 }

</bundles_post_ra>
